<compile_context>
chip_gen: v5e
topology: v5e:2x2
jax: 0.10.0
libtpu: 0.0.40
codegen_flags: <defaults>
</compile_context>

<pallas_src>
import jax
import jax.numpy as jnp
from jax.experimental import pallas as pl
from jax.experimental.pallas import tpu as pltpu

HL_SIZE = 64
INPUT_SIZE = 768
QA = 255
QB = 64
SCALE = 400


def nnue_kernel(xw_ref, xb_ref, stm_ref, wt_ref, b_ref, ow_ref, ob_ref, out_ref):
    # Widen int8 0/1 features to bf16 on the VPU (hidden under the feature DMA),
    # then two native bf16 x bf16 -> f32 MXU matmuls against the resident weight.
    xw = xw_ref[...].astype(jnp.bfloat16)                    # (TB, 768)
    xb = xb_ref[...].astype(jnp.bfloat16)                    # (TB, 768)
    w = wt_ref[...]                                          # (768, HL) bf16, resident
    acc_w = jnp.dot(xw, w, preferred_element_type=jnp.float32)
    acc_b = jnp.dot(xb, w, preferred_element_type=jnp.float32)
    acc_w = jnp.clip(acc_w + b_ref[...], 0.0, float(QA))     # (TB, HL)
    acc_b = jnp.clip(acc_b + b_ref[...], 0.0, float(QA))     # (TB, HL)

    # Output layer on the VPU: per-row select of the (pre-scaled) output-weight
    # rows by side-to-move, then a lane reduction over HL=64.
    #   stm == 0 (white to move): combined = [white, black] -> white*ow1 + black*ow2
    #   stm != 0 (black to move): combined = [black, white] -> black*ow1 + white*ow2
    stm = stm_ref[...] != 0                                  # (TB, 1) bool
    ow1 = ow_ref[0:1, :]                                     # (1, HL) first-half weights
    ow2 = ow_ref[1:2, :]                                     # (1, HL) second-half weights
    w_white = jnp.where(stm, ow2, ow1)                       # (TB, HL)
    w_black = jnp.where(stm, ow1, ow2)                       # (TB, HL)
    e = jnp.sum(acc_w * w_white + acc_b * w_black, axis=-1, keepdims=True)  # (TB, 1)
    out_ref[...] = e + ob_ref[...]                           # SCALE/(QA*QB) pre-folded


def _round_up(x, m):
    return (x + m - 1) // m * m


def nnue_forward(x_white, x_black, side_to_move, acc_w, acc_b, out_w, out_b,
                 *, block_b=2048):
    """x_white/x_black: (B, INPUT_SIZE) 0/1 feature planes (store as int8!);
    side_to_move: (B,) int; acc_w: (HL, INPUT) torch Linear.weight layout;
    acc_b: (HL,); out_w: (2*HL, 1); out_b: (1,). Returns (B, 1) float32."""
    B = x_white.shape[0]

    # Features should be stored int8 end-to-end; casting here costs an extra HBM
    # pass and exists only as a convenience fallback.
    xw = x_white if x_white.dtype == jnp.int8 else x_white.astype(jnp.int8)
    xb = x_black if x_black.dtype == jnp.int8 else x_black.astype(jnp.int8)
    stm = jnp.asarray(side_to_move, jnp.int32).reshape(B, 1)

    # Tiny, VMEM-resident parameters (one-time wrapper-side prep, negligible).
    wt = jnp.asarray(acc_w, jnp.float32).T.astype(jnp.bfloat16)     # (768, HL)
    b2 = jnp.asarray(acc_b, jnp.float32).reshape(1, HL_SIZE)        # (1, HL)
    s = float(SCALE) / float(QA * QB)
    ow_pair = (jnp.asarray(out_w, jnp.float32).reshape(2, HL_SIZE) * s)  # pre-scaled
    ob = (jnp.asarray(out_b, jnp.float32) * s).reshape(1, 1)             # pre-scaled

    # Batch tiling: int8 rows pack 32/sublane-tile; ragged tails are masked
    # (no jnp.pad). Ensure >=2 tiles on medium batches so ("parallel",) can
    # shard the batch across both TensorCores on v7x.
    block_b = max(32, _round_up(block_b, 32))
    TB = min(block_b, _round_up(B, 32))
    if pl.cdiv(B, TB) == 1 and B > 256:
        TB = _round_up(-(-B // 2), 32)
    n_tiles = pl.cdiv(B, TB)

    cost = pl.CostEstimate(
        flops=2 * 2 * B * INPUT_SIZE * HL_SIZE + 4 * B * HL_SIZE,
        transcendentals=0,
        bytes_accessed=(2 * B * INPUT_SIZE * 1                      # int8 features
                        + B * 4                                     # stm
                        + (INPUT_SIZE * HL_SIZE * 2                 # bf16 weight
                           + HL_SIZE * 4 + 2 * HL_SIZE * 4 + 4)     # biases / out weights
                        + B * 4))                                   # output

    out = pl.pallas_call(
        nnue_kernel,
        out_shape=jax.ShapeDtypeStruct((B, 1), jnp.float32),
        grid=(n_tiles,),
        in_specs=[
            pl.BlockSpec((TB, INPUT_SIZE), lambda i: (i, 0)),       # white features
            pl.BlockSpec((TB, INPUT_SIZE), lambda i: (i, 0)),       # black features
            pl.BlockSpec((TB, 1), lambda i: (i, 0)),                # side_to_move
            pl.BlockSpec((INPUT_SIZE, HL_SIZE), lambda i: (0, 0)),  # acc weight^T (resident)
            pl.BlockSpec((1, HL_SIZE), lambda i: (0, 0)),           # acc bias     (resident)
            pl.BlockSpec((2, HL_SIZE), lambda i: (0, 0)),           # output weights (resident)
            pl.BlockSpec((1, 1), lambda i: (0, 0)),                 # output bias  (resident)
        ],
        out_specs=pl.BlockSpec((TB, 1), lambda i: (i, 0)),
        compiler_params=pltpu.CompilerParams(
            dimension_semantics=("parallel",),
            vmem_limit_bytes=32 * 1024 * 1024),
        cost_estimate=cost,
    )(xw, xb, stm, wt, b2, ow_pair, ob)
    return out


def _reference(x_white, x_black, side_to_move, acc_w, acc_b, out_w, out_b):
    """Pure-JAX f32 reference mirroring the PyTorch forward exactly."""
    xw = jnp.asarray(x_white, jnp.float32)
    xb = jnp.asarray(x_black, jnp.float32)
    w_acc = jnp.clip(xw @ acc_w.T + acc_b, 0, QA)
    b_acc = jnp.clip(xb @ acc_w.T + acc_b, 0, QA)
    combined = jnp.where(
        side_to_move.reshape(-1, 1).astype(bool),
        jnp.concatenate([b_acc, w_acc], axis=1),
        jnp.concatenate([w_acc, b_acc], axis=1),
    )
    eval_raw = combined @ out_w + out_b
    return eval_raw * SCALE / (QA * QB)


if __name__ == "__main__":
    key = jax.random.PRNGKey(0)
    k_xw, k_xb, k_stm, k_w, k_b, k_ow, k_ob = jax.random.split(key, 7)

    B = 8
    # Sparse 0/1 feature planes like real NNUE inputs, stored int8 end-to-end.
    x_white = (jax.random.uniform(k_xw, (B, INPUT_SIZE)) < 0.05).astype(jnp.int8)
    x_black = (jax.random.uniform(k_xb, (B, INPUT_SIZE)) < 0.05).astype(jnp.int8)
    side_to_move = jax.random.bernoulli(k_stm, 0.5, (B,)).astype(jnp.int32)

    acc_w = jax.random.normal(k_w, (HL_SIZE, INPUT_SIZE), jnp.float32) * jnp.sqrt(2.0 / INPUT_SIZE)
    acc_b = jax.random.uniform(k_b, (HL_SIZE,), jnp.float32,
                               -1.0 / jnp.sqrt(INPUT_SIZE), 1.0 / jnp.sqrt(INPUT_SIZE))
    out_w = jax.random.normal(k_ow, (2 * HL_SIZE, 1), jnp.float32)
    out_b = jax.random.normal(k_ob, (1,), jnp.float32)

    # bf16-rounded copy of the accumulator weight (what the kernel's MXU path
    # uses); 0/1 features make every bf16 product exact, so this reference
    # matches the kernel to f32-accumulation accuracy.
    acc_w_bf16 = acc_w.astype(jnp.bfloat16).astype(jnp.float32)

    # Single-tile path (small batch).
    out = nnue_forward(x_white, x_black, side_to_move, acc_w, acc_b, out_w, out_b)
    out = jax.block_until_ready(out)
    assert out.shape == (B, 1)
    ref_tight = _reference(x_white, x_black, side_to_move, acc_w_bf16, acc_b, out_w, out_b)
    assert jnp.allclose(out, ref_tight, rtol=1e-4, atol=1e-4), (out, ref_tight)
    ref_f32 = _reference(x_white, x_black, side_to_move, acc_w, acc_b, out_w, out_b)
    assert jnp.allclose(out, ref_f32, rtol=1e-2, atol=5e-3), (out, ref_f32)

    # Multi-tile path (batch grid + masked ragged tail block, no padding).
    B2 = 300
    k_a, k_c, k_d = jax.random.split(key, 3)
    xw2 = (jax.random.uniform(k_a, (B2, INPUT_SIZE)) < 0.05).astype(jnp.int8)
    xb2 = (jax.random.uniform(k_c, (B2, INPUT_SIZE)) < 0.05).astype(jnp.int8)
    stm2 = jax.random.bernoulli(k_d, 0.5, (B2,)).astype(jnp.int32)
    out2 = nnue_forward(xw2, xb2, stm2, acc_w, acc_b, out_w, out_b, block_b=128)
    out2 = jax.block_until_ready(out2)
    assert out2.shape == (B2, 1)
    ref2_tight = _reference(xw2, xb2, stm2, acc_w_bf16, acc_b, out_w, out_b)
    assert jnp.allclose(out2, ref2_tight, rtol=1e-4, atol=1e-4)
    ref2_f32 = _reference(xw2, xb2, stm2, acc_w, acc_b, out_w, out_b)
    assert jnp.allclose(out2, ref2_f32, rtol=1e-2, atol=5e-3)

    print("KERNEL_OK")
</pallas_src>

<mosaic_0001>
module attributes {stable_mosaic.version = 11 : i64} {
  func.func @nnue_kernel(%arg0: i32, %arg1: memref<32x768xi8, #tpu.memory_space<vmem>>, %arg2: memref<32x768xi8, #tpu.memory_space<vmem>>, %arg3: memref<32x1xi32, #tpu.memory_space<vmem>>, %arg4: memref<768x64xbf16, #tpu.memory_space<vmem>>, %arg5: memref<1x64xf32, #tpu.memory_space<vmem>>, %arg6: memref<2x64xf32, #tpu.memory_space<vmem>>, %arg7: memref<1x1xf32, #tpu.memory_space<vmem>>, %arg8: memref<32x1xf32, #tpu.memory_space<vmem>>) attributes {dimension_semantics = [#tpu.dimension_semantics<parallel>], iteration_bounds = array<i64: 1>, scalar_prefetch = 0 : i64, scratch_operands = 0 : i64, tpu.core_type = #tpu.core_type<tc>, window_params = [{transform_indices = @transform_0, window_bounds = array<i64: 32, 768>}, {transform_indices = @transform_1, window_bounds = array<i64: 32, 768>}, {transform_indices = @transform_2, window_bounds = array<i64: 32, 1>}, {pipeline_mode = #tpu.pipeline_mode<synchronous>, transform_indices = @transform_3, window_bounds = array<i64: 768, 64>}, {pipeline_mode = #tpu.pipeline_mode<synchronous>, transform_indices = @transform_4, window_bounds = array<i64: 1, 64>}, {pipeline_mode = #tpu.pipeline_mode<synchronous>, transform_indices = @transform_5, window_bounds = array<i64: 2, 64>}, {pipeline_mode = #tpu.pipeline_mode<synchronous>, transform_indices = @transform_6, window_bounds = array<i64: 1, 1>}, {transform_indices = @transform_7, window_bounds = array<i64: 32, 1>}]} {
    %c0 = arith.constant 0 : index
    %c0_0 = arith.constant 0 : index
    %0 = vector.load %arg1[%c0, %c0_0] : memref<32x768xi8, #tpu.memory_space<vmem>>, vector<32x768xi8>
    %1 = arith.sitofp %0 : vector<32x768xi8> to vector<32x768xbf16>
    %c0_1 = arith.constant 0 : index
    %c0_2 = arith.constant 0 : index
    %2 = vector.load %arg2[%c0_1, %c0_2] : memref<32x768xi8, #tpu.memory_space<vmem>>, vector<32x768xi8>
    %3 = arith.sitofp %2 : vector<32x768xi8> to vector<32x768xbf16>
    %c0_3 = arith.constant 0 : index
    %c0_4 = arith.constant 0 : index
    %4 = vector.load %arg4[%c0_3, %c0_4] : memref<768x64xbf16, #tpu.memory_space<vmem>>, vector<768x64xbf16>
    %cst = arith.constant dense<0.000000e+00> : vector<32x64xf32>
    %5 = tpu.matmul %1, %4, %cst {dimension_numbers = #tpu.dot_dimension_numbers<[1], [0], [0], [1], [0, 0, 1, 1], [], []>} : vector<32x768xbf16>, vector<768x64xbf16>, vector<32x64xf32> -> vector<32x64xf32>
    %cst_5 = arith.constant dense<0.000000e+00> : vector<32x64xf32>
    %6 = tpu.matmul %3, %4, %cst_5 {dimension_numbers = #tpu.dot_dimension_numbers<[1], [0], [0], [1], [0, 0, 1, 1], [], []>} : vector<32x768xbf16>, vector<768x64xbf16>, vector<32x64xf32> -> vector<32x64xf32>
    %c0_6 = arith.constant 0 : index
    %c0_7 = arith.constant 0 : index
    %7 = vector.load %arg5[%c0_6, %c0_7] : memref<1x64xf32, #tpu.memory_space<vmem>>, vector<1x64xf32>
    %8 = vector.broadcast %7 : vector<1x64xf32> to vector<32x64xf32>
    %9 = arith.addf %5, %8 : vector<32x64xf32>
    %cst_8 = arith.constant 0.000000e+00 : f32
    %cst_9 = arith.constant 2.550000e+02 : f32
    %10 = vector.broadcast %cst_8 : f32 to vector<32x64xf32>
    %11 = arith.maximumf %10, %9 : vector<32x64xf32>
    %12 = vector.broadcast %cst_9 : f32 to vector<32x64xf32>
    %13 = arith.minimumf %12, %11 : vector<32x64xf32>
    %c0_10 = arith.constant 0 : index
    %c0_11 = arith.constant 0 : index
    %14 = vector.load %arg5[%c0_10, %c0_11] : memref<1x64xf32, #tpu.memory_space<vmem>>, vector<1x64xf32>
    %15 = vector.broadcast %14 : vector<1x64xf32> to vector<32x64xf32>
    %16 = arith.addf %6, %15 : vector<32x64xf32>
    %cst_12 = arith.constant 0.000000e+00 : f32
    %cst_13 = arith.constant 2.550000e+02 : f32
    %17 = vector.broadcast %cst_12 : f32 to vector<32x64xf32>
    %18 = arith.maximumf %17, %16 : vector<32x64xf32>
    %19 = vector.broadcast %cst_13 : f32 to vector<32x64xf32>
    %20 = arith.minimumf %19, %18 : vector<32x64xf32>
    %c0_14 = arith.constant 0 : index
    %c0_15 = arith.constant 0 : index
    %21 = vector.load %arg3[%c0_14, %c0_15] : memref<32x1xi32, #tpu.memory_space<vmem>>, vector<32x1xi32>
    %c0_i32 = arith.constant 0 : i32
    %22 = vector.broadcast %c0_i32 : i32 to vector<32x1xi32>
    %23 = arith.cmpi ne, %21, %22 : vector<32x1xi32>
    %c0_16 = arith.constant 0 : index
    %c0_17 = arith.constant 0 : index
    %24 = vector.load %arg6[%c0_16, %c0_17] : memref<2x64xf32, #tpu.memory_space<vmem>>, vector<1x64xf32>
    %c1 = arith.constant 1 : index
    %c0_18 = arith.constant 0 : index
    %25 = vector.load %arg6[%c1, %c0_18] : memref<2x64xf32, #tpu.memory_space<vmem>>, vector<1x64xf32>
    %26 = vector.shape_cast %23 : vector<32x1xi1> to vector<32x1xi1>
    %27 = vector.broadcast %26 : vector<32x1xi1> to vector<32x64xi1>
    %28 = vector.shape_cast %25 : vector<1x64xf32> to vector<1x64xf32>
    %29 = vector.broadcast %28 : vector<1x64xf32> to vector<32x64xf32>
    %30 = vector.shape_cast %24 : vector<1x64xf32> to vector<1x64xf32>
    %31 = vector.broadcast %30 : vector<1x64xf32> to vector<32x64xf32>
    %32 = arith.select %27, %29, %31 : vector<32x64xi1>, vector<32x64xf32>
    %33 = vector.shape_cast %23 : vector<32x1xi1> to vector<32x1xi1>
    %34 = vector.broadcast %33 : vector<32x1xi1> to vector<32x64xi1>
    %35 = vector.shape_cast %24 : vector<1x64xf32> to vector<1x64xf32>
    %36 = vector.broadcast %35 : vector<1x64xf32> to vector<32x64xf32>
    %37 = vector.shape_cast %25 : vector<1x64xf32> to vector<1x64xf32>
    %38 = vector.broadcast %37 : vector<1x64xf32> to vector<32x64xf32>
    %39 = arith.select %34, %36, %38 : vector<32x64xi1>, vector<32x64xf32>
    %40 = arith.mulf %13, %32 : vector<32x64xf32>
    %41 = arith.mulf %20, %39 : vector<32x64xf32>
    %42 = arith.addf %40, %41 : vector<32x64xf32>
    %cst_19 = arith.constant dense<0.000000e+00> : vector<32xf32>
    %43 = vector.multi_reduction <add>, %42, %cst_19 [1] : vector<32x64xf32> to vector<32xf32>
    %44 = vector.shape_cast %43 : vector<32xf32> to vector<32x1xf32>
    %c0_20 = arith.constant 0 : index
    %c0_21 = arith.constant 0 : index
    %45 = vector.load %arg7[%c0_20, %c0_21] : memref<1x1xf32, #tpu.memory_space<vmem>>, vector<1x1xf32>
    %46 = vector.broadcast %45 : vector<1x1xf32> to vector<32x1xf32>
    %47 = arith.addf %44, %46 : vector<32x1xf32>
    %c0_22 = arith.constant 0 : index
    %c0_23 = arith.constant 0 : index
    %48 = vector.load %arg8[%c0_22, %c0_23] : memref<32x1xf32, #tpu.memory_space<vmem>>, vector<32x1xf32>
    tpu.vector_store %arg8[%c0_22, %c0_23], %47 {strides = array<i32>} : memref<32x1xf32, #tpu.memory_space<vmem>>, vector<32x1xf32>,
    return
  }
  func.func @transform_0(%arg0: i32) -> (i32, i32) {
    %c0_i32 = arith.constant 0 : i32
    %c0_i32_0 = arith.constant 0 : i32
    return %arg0, %c0_i32 : i32, i32
  }
  func.func @transform_1(%arg0: i32) -> (i32, i32) {
    %c0_i32 = arith.constant 0 : i32
    %c0_i32_0 = arith.constant 0 : i32
    return %arg0, %c0_i32 : i32, i32
  }
  func.func @transform_2(%arg0: i32) -> (i32, i32) {
    %c0_i32 = arith.constant 0 : i32
    %c0_i32_0 = arith.constant 0 : i32
    return %arg0, %c0_i32 : i32, i32
  }
  func.func @transform_3(%arg0: i32) -> (i32, i32) {
    %c0_i32 = arith.constant 0 : i32
    %c0_i32_0 = arith.constant 0 : i32
    %c0_i32_1 = arith.constant 0 : i32
    return %c0_i32, %c0_i32_0 : i32, i32
  }
  func.func @transform_4(%arg0: i32) -> (i32, i32) {
    %c0_i32 = arith.constant 0 : i32
    %c0_i32_0 = arith.constant 0 : i32
    %c0_i32_1 = arith.constant 0 : i32
    return %c0_i32, %c0_i32_0 : i32, i32
  }
  func.func @transform_5(%arg0: i32) -> (i32, i32) {
    %c0_i32 = arith.constant 0 : i32
    %c0_i32_0 = arith.constant 0 : i32
    %c0_i32_1 = arith.constant 0 : i32
    return %c0_i32, %c0_i32_0 : i32, i32
  }
  func.func @transform_6(%arg0: i32) -> (i32, i32) {
    %c0_i32 = arith.constant 0 : i32
    %c0_i32_0 = arith.constant 0 : i32
    %c0_i32_1 = arith.constant 0 : i32
    return %c0_i32, %c0_i32_0 : i32, i32
  }
  func.func @transform_7(%arg0: i32) -> (i32, i32) {
    %c0_i32 = arith.constant 0 : i32
    %c0_i32_0 = arith.constant 0 : i32
    return %arg0, %c0_i32 : i32, i32
  }
}

</mosaic_0001>

<bundles_post_ra>
// kernel: tpu_custom_call.1
= control target key start
LH: loop header
LB: loop body
LE: loop exit
PB: predicated region body
PF: predicated region fallthrough
CT: control target
= control target key end

     0   :  { %s1699_s0 = inlined_call_operand.vmem [shape: s8[8,768], index: 0, kind: input, shape index: {}]   ;;  %s1700_s1 = inlined_call_operand.vmem [shape: s8[8,768], index: 1, kind: input, shape index: {}]   ;;  %s1701_s2 = inlined_call_operand.vmem [shape: s32[8,1], index: 2, kind: input, shape index: {}]   ;;  %s1702_s3 = inlined_call_operand.vmem [shape: bf16[768,64], index: 3, kind: input, shape index: {}]   ;;  %s1703_s4 = inlined_call_operand.vmem [shape: f32[1,64], index: 4, kind: input, shape index: {}]   ;;  %s1704_s5 = inlined_call_operand.vmem [shape: f32[2,64], index: 5, kind: input, shape index: {}]   ;;  %s1705_s6 = inlined_call_operand.<no memory space> [shape: f32[1,1], index: 6, kind: input, shape index: {}]   ;;  %s1706_s7 = inlined_call_operand.vmem [shape: f32[8,1], index: 7, kind: output, shape index: {}]  }
   0x1   :  { %v12_v0 = vstv %s1705_s6 }
   0x2   :  { %13 = vst [vmem:[#allocation2] sm:$0x1] %v12_v0 }
   0x3   :  { %v1209_v1 = vld [vmem:[%s1702_s3 + $0x38] sm:$0xff]  ;;  %v1231_v5 = vld [vmem:[%s1702_s3 + $0x30] sm:$0xff]  ;;  %v1255_v9 = vld [vmem:[%s1702_s3 + $0x28] sm:$0xff]  ;;  %vm848_vm6 = vcmask 523264   ;;  %vm869_vm9 = vcmask 7168  }
   0x4   :  { %v1214_v2 = vld [vmem:[%s1702_s3 + $0x78] sm:$0xff]  ;;  %552 = vmatpush.bf16.msra.mxu0 %v1209_v1  ;;  %v1236_v6 = vld [vmem:[%s1702_s3 + $0x70] sm:$0xff]  ;;  %v1260_v10 = vld [vmem:[%s1702_s3 + $0x68] sm:$0xff] }
   0x5   :  { %v1219_v3 = vld [vmem:[%s1702_s3 + $0xb8] sm:$0xff]  ;;  %571 = vmatpush.bf16.msra.mxu1 %v1214_v2  ;;  %v1243_v7 = vld [vmem:[%s1702_s3 + $0xb0] sm:$0xff]  ;;  %v1267_v11 = vld [vmem:[%s1702_s3 + $0xa8] sm:$0xff] }
   0x6   :  { %v1224_v4 = vld [vmem:[%s1702_s3 + $0xf8] sm:$0xff]  ;;  %590 = vmatpush.bf16.msra.mxu2 %v1219_v3  ;;  %v1248_v8 = vld [vmem:[%s1702_s3 + $0xf0] sm:$0xff]  ;;  %v1272_v12 = vld [vmem:[%s1702_s3 + $0xe8] sm:$0xff] }
   0x7   :  { %609 = vmatpush.bf16.msra.mxu3 %v1224_v4  ;;  %v1279_v13 = vld [vmem:[%s1702_s3 + $0x20] sm:$0xff]  ;;  %v1301_v17 = vld [vmem:[%s1702_s3 + $0x18] sm:$0xff]  ;;  %v1325_v21 = vld [vmem:[%s1702_s3 + $0x10] sm:$0xff] }
   0x8   :  { %553 = vmatpush.bf16.msra.mxu0 %v1231_v5  ;;  %v1284_v14 = vld [vmem:[%s1702_s3 + $0x60] sm:$0xff]  ;;  %v1306_v18 = vld [vmem:[%s1702_s3 + $0x58] sm:$0xff]  ;;  %v1332_v22 = vld [vmem:[%s1702_s3 + $0x50] sm:$0xff] }
   0x9   :  { %572 = vmatpush.bf16.msra.mxu1 %v1236_v6  ;;  %v1291_v15 = vld [vmem:[%s1702_s3 + $0xa0] sm:$0xff]  ;;  %v1313_v19 = vld [vmem:[%s1702_s3 + $0x98] sm:$0xff]  ;;  %v30_v24 = vld [vmem:[%s1699_s0 + $0xc] sm:$0xff] }
   0xa   :  { %591 = vmatpush.bf16.msra.mxu2 %v1243_v7  ;;  %v1296_v16 = vld [vmem:[%s1702_s3 + $0xe0] sm:$0xff]  ;;  %v1318_v20 = vld [vmem:[%s1702_s3 + $0xd8] sm:$0xff]  ;;  %v1345_v25 = vld [vmem:[%s1702_s3 + $0x90] sm:$0xff]  ;;  %v42_v28 = vunpack.c.0.s8 %v30_v24  ;;  %v43_v30 = vunpack.c.1.s8 %v30_v24  ;;  %v44_v34 = vunpack.c.2.s8 %v30_v24  ;;  %v45_v36 = vunpack.c.3.s8 %v30_v24 }
   0xb   :  { %610 = vmatpush.bf16.msra.mxu3 %v1248_v8  ;;  %v28_v23 = vld [vmem:[%s1699_s0] sm:$0xff]  ;;  %v1350_v26 = vld [vmem:[%s1702_s3 + $0xd0] sm:$0xff]  ;;  %v1357_v31 = vld [vmem:[%s1702_s3 + $0x8] sm:$0xff] }
   0xc   :  { %554 = vmatpush.bf16.msra.mxu0 %v1255_v9  ;;  %v36_v27 = vunpack.c.0.s8 %v28_v23  ;;  %v37_v29 = vunpack.c.1.s8 %v28_v23  ;;  %v1362_v32 = vld [vmem:[%s1702_s3 + $0x48] sm:$0xff]  ;;  %v38_v33 = vunpack.c.2.s8 %v28_v23  ;;  %v39_v35 = vunpack.c.3.s8 %v28_v23  ;;  %v1381_v43 = vld [vmem:[%s1702_s3] sm:$0xff]  ;;  %v1403_v51 = vld [vmem:[%s1702_s3 + $0x138] sm:$0xff] }
   0xd   :  { %573 = vmatpush.bf16.msra.mxu1 %v1260_v10  ;;  %v1369_v37 = vld [vmem:[%s1702_s3 + $0x88] sm:$0xff]  ;;  %v66_v40 = vcvt.s32.f32 %v42_v28  ;;  %v67_v42 = vcvt.s32.f32 %v43_v30  ;;  %v1386_v44 = vld [vmem:[%s1702_s3 + $0x40] sm:$0xff]  ;;  %v68_v46 = vcvt.s32.f32 %v44_v34  ;;  %v69_v48 = vcvt.s32.f32 %v45_v36  ;;  %v1412_v56 = vld [vmem:[%s1702_s3 + $0x178] sm:$0xff] }
   0xe   :  { %592 = vmatpush.bf16.msra.mxu2 %v1267_v11  ;;  %v1374_v38 = vld [vmem:[%s1702_s3 + $0xc8] sm:$0xff]  ;;  %v60_v39 = vcvt.s32.f32 %v36_v27  ;;  %v61_v41 = vcvt.s32.f32 %v37_v29  ;;  %v62_v45 = vcvt.s32.f32 %v38_v33  ;;  %v63_v47 = vcvt.s32.f32 %v39_v35  ;;  %v1393_v49 = vld [vmem:[%s1702_s3 + $0x80] sm:$0xff]  ;;  %v1419_v57 = vld [vmem:[%s1702_s3 + $0x130] sm:$0xff] }
   0xf   :  { %611 = vmatpush.bf16.msra.mxu3 %v1272_v12  ;;  %v1398_v50 = vld [vmem:[%s1702_s3 + $0xc0] sm:$0xff]  ;;  %v32_v58 = vld [vmem:[%s1699_s0 + $0x18] sm:$0xff]  ;;  %v1432_v60 = vld [vmem:[%s1702_s3 + $0x170] sm:$0xff] }
  0x10   :  { %555 = vmatpush.bf16.msra.mxu0 %v1279_v13  ;;  %v84_v52 = vpack.c.bf16 %v66_v40, %v60_v39  ;;  %v85_v53 = vpack.c.bf16 %v67_v42, %v61_v41  ;;  %v86_v54 = vpack.c.bf16 %v68_v46, %v62_v45  ;;  %v87_v55 = vpack.c.bf16 %v69_v48, %v63_v47  ;;  %v34_v59 = vld [vmem:[%s1699_s0 + $0x24] sm:$0xff]  ;;  %v1467_v40 = vld [vmem:[%s1702_s3 + $0x118] sm:$0xff]  ;;  %v1483_v47 = vld [vmem:[%s1702_s3 + $0x110] sm:$0xff] }
  0x11   :  { %574 = vmatpush.bf16.msra.mxu1 %v1284_v14  ;;  %v1439_v61 = vld [vmem:[%s1702_s3 + $0x128] sm:$0xff]  ;;  %v48_v62 = vunpack.c.0.s8 %v32_v58  ;;  %v54_v63 = vunpack.c.0.s8 %v34_v59  ;;  %v49_v0 = vunpack.c.1.s8 %v32_v58  ;;  %v50_v23 = vunpack.c.2.s8 %v32_v58  ;;  %v1453_v28 = vld [vmem:[%s1702_s3 + $0x120] sm:$0xff] }
  0x12   :  { %593 = vmatpush.bf16.msra.mxu2 %v1291_v15  ;;  %v51_v24 = vunpack.c.3.s8 %v32_v58  ;;  %v57_v27 = vunpack.c.3.s8 %v34_v59  ;;  %v1162_v45 = vmov 0   ;;  %v29_v48 = vld [vmem:[%s1699_s0 + $0x8] sm:$0xf] }
  0x13   :  { %612 = vmatpush.bf16.msra.mxu3 %v1296_v16  ;;  %v72_v29 = vcvt.s32.f32 %v48_v62  ;;  %v78_v30 = vcvt.s32.f32 %v54_v63  ;;  %v73_v33 = vcvt.s32.f32 %v49_v0  ;;  %v74_v35 = vcvt.s32.f32 %v50_v23  ;;  %1156 = vset.pattern.permute.xlu0 %v1162_v45  ;;  %v797_v62 = vld [vmem:[%s1701_s2 + $0x8] sm:$0xff] }
  0x14   :  { %556 = vmatpush.bf16.msra.mxu0 %v1301_v17  ;;  %v75_v36 = vcvt.s32.f32 %v51_v24  ;;  %v81_v39 = vcvt.s32.f32 %v57_v27  ;;  %1157 = vset.pattern.permute.xlu1 %v1162_v45  ;;  %v40_v58 = vunpack.c.0.s8 %v29_v48  ;;  %v41_v63 = vunpack.c.1.s8 %v29_v48  ;;  %v1529_v23 = vld [vmem:[%s1702_s3 + $0x148] sm:$0xff]  ;;  %v1538_v27 = vld [vmem:[%s1702_s3 + $0x100] sm:$0xff] }
  0x15   :  { %575 = vmatpush.bf16.msra.mxu1 %v1306_v18  ;;  %v90_v41 = vpack.c.bf16 %v78_v30, %v72_v29  ;;  %vm801_vm1 = vcmp.ne.s32.totalorder %v797_v62, 0 }
  0x16   :  { %594 = vmatpush.bf16.msra.mxu2 %v1313_v19  ;;  %v93_v46 = vpack.c.bf16 %v81_v39, %v75_v36  ;;  %v65_v30 = vcvt.s32.f32 %v41_v63  ;;  %v807_v39 = vsel %vm801_vm1, 1, %v1162_v45 }
  0x17   :  { %613 = vmatpush.bf16.msra.mxu3 %v1318_v20 }
  0x18   :  { %557 = vmatpush.bf16.msra.mxu0 %v1325_v21 }
  0x19   :  { %576 = vmatpush.bf16.msra.mxu1 %v1332_v22 }
  0x1a   :  { %595 = vmatpush.bf16.msra.mxu2 %v1345_v25 }
  0x1b   :  { %614 = vmatpush.bf16.msra.mxu3 %v1350_v26 }
  0x1c   :  { %558 = vmatpush.bf16.msra.mxu0 %v1357_v31 }
  0x1d   :  { %577 = vmatpush.bf16.msra.mxu1 %v1362_v32 }
  0x1e   :  { %596 = vmatpush.bf16.msra.mxu2 %v1369_v37 }
  0x1f   :  { %615 = vmatpush.bf16.msra.mxu3 %v1374_v38 }
  0x20   :  { %559 = vmatpush.bf16.msra.mxu0 %v1381_v43 }
  0x21   :  { %578 = vmatpush.bf16.msra.mxu1 %v1386_v44 }
  0x22   :  { %597 = vmatpush.bf16.msra.mxu2 %v1393_v49 }
  0x23   :  { %616 = vmatpush.bf16.msra.mxu3 %v1398_v50  ;;  %560 = vmatmul.bf16.vlgmr.msra.gmra.mxu0 %v84_v52  ;;  %v1499_v52 = vld [vmem:[%s1702_s3 + $0x150] sm:$0xff] }
  0x24   :  { %628 = vmatpush.bf16.msrb.mxu0 %v1403_v51  ;;  %579 = vmatmul.bf16.vlgmr.msra.gmra.mxu1 %v85_v53  ;;  %v1504_v53 = vld [vmem:[%s1700_s1] sm:$0xff] }
  0x25   :  { %598 = vmatmul.bf16.vlgmr.msra.gmra.mxu2 %v86_v54  ;;  %647 = vmatpush.bf16.msrb.mxu1 %v1412_v56  ;;  %v1509_v54 = vld [vmem:[%s1700_s1 + $0xc] sm:$0xff] }
  0x26   :  { %674 = vmatpush.bf16.msrb.mxu2 %v1209_v1  ;;  %617 = vmatmul.bf16.vlgmr.msra.gmra.mxu3 %v87_v55  ;;  %v55_v1 = vunpack.c.1.s8 %v34_v59  ;;  %v111_v24 = vunpack.c.1.s8 %v1509_v54 }
  0x27   :  { %693 = vmatpush.bf16.msrb.mxu3 %v1214_v2  ;;  %v56_v2 = vunpack.c.2.s8 %v34_v59 }
  0x28   :  { %629 = vmatpush.bf16.msrb.mxu0 %v1419_v57  ;;  %v79_v34 = vcvt.s32.f32 %v55_v1  ;;  %v104_v1 = vunpack.c.0.s8 %v1504_v53  ;;  %v135_v36 = vcvt.s32.f32 %v111_v24 }
  0x29   :  { %648 = vmatpush.bf16.msrb.mxu1 %v1432_v60 }
  0x2a   :  { %675 = vmatpush.bf16.msrb.mxu2 %v1231_v5  ;;  %v1446_v5 = vld [vmem:[%s1702_s3 + $0x168] sm:$0xff]  ;;  %v91_v42 = vpack.c.bf16 %v79_v34, %v73_v33  ;;  %v128_v34 = vcvt.s32.f32 %v104_v1 }
  0x2b   :  { %694 = vmatpush.bf16.msrb.mxu3 %v1236_v6  ;;  %v80_v6 = vcvt.s32.f32 %v56_v2  ;;  %v105_v2 = vunpack.c.1.s8 %v1504_v53 }
  0x2c   :  { %630 = vmatpush.bf16.msrb.mxu0 %v1439_v61 }
  0x2d   :  { %649 = vmatpush.bf16.msrb.mxu1 %v1446_v5 }
  0x2e   :  { %676 = vmatpush.bf16.msrb.mxu2 %v1255_v9  ;;  %v1460_v9 = vld [vmem:[%s1702_s3 + $0x160] sm:$0xff] }
  0x2f   :  { %695 = vmatpush.bf16.msrb.mxu3 %v1260_v10  ;;  %v92_v10 = vpack.c.bf16 %v80_v6, %v74_v35  ;;  %v129_v6 = vcvt.s32.f32 %v105_v2 }
  0x30   :  { %631 = vmatpush.bf16.msrb.mxu0 %v1453_v28 }
  0x31   :  { %650 = vmatpush.bf16.msrb.mxu1 %v1460_v9 }
  0x32   :  { %677 = vmatpush.bf16.msrb.mxu2 %v1279_v13  ;;  %v1476_v13 = vld [vmem:[%s1702_s3 + $0x158] sm:$0xff] }
  0x33   :  { %696 = vmatpush.bf16.msrb.mxu3 %v1284_v14  ;;  %565 = vmatmul.bf16.gmra.mxu0 %v90_v41  ;;  %v796_v14 = vld [vmem:[%s1701_s2] sm:$0xff] }
  0x34   :  { %632 = vmatpush.bf16.msrb.mxu0 %v1467_v40  ;;  %584 = vmatmul.bf16.gmra.mxu1 %v91_v42  ;;  %vm800_vm0 = vcmp.ne.s32.totalorder %v796_v14, 0 }
  0x35   :  { %603 = vmatmul.bf16.gmra.mxu2 %v92_v10  ;;  %651 = vmatpush.bf16.msrb.mxu1 %v1476_v13  ;;  %v806_v55 = vsel %vm800_vm0, 1, %v1162_v45  ;;  %v153_v10 = vpack.c.bf16 %v135_v36, %v129_v6 }
  0x36   :  { %678 = vmatpush.bf16.msrb.mxu2 %v1301_v17  ;;  %622 = vmatmul.bf16.gmra.mxu3 %v93_v46  ;;  %v31_v17 = vld [vmem:[%s1699_s0 + $0x14] sm:$0xf] }
  0x37   :  { %697 = vmatpush.bf16.msrb.mxu3 %v1306_v18  ;;  %v1517_v18 = vld [vmem:[%s1702_s3 + $0x108] sm:$0xff]  ;;  %v46_v59 = vunpack.c.0.s8 %v31_v17  ;;  %811 = vperm.xlu0 %1156, %v806_v55   ;;  %v47_v0 = vunpack.c.1.s8 %v31_v17 }
  0x38   :  { %633 = vmatpush.bf16.msrb.mxu0 %v1483_v47 }
  0x39   :  { %652 = vmatpush.bf16.msrb.mxu1 %v1499_v52  ;;  %v70_v29 = vcvt.s32.f32 %v46_v59  ;;  %v71_v33 = vcvt.s32.f32 %v47_v0 }
  0x3a   :  { %679 = vmatpush.bf16.msrb.mxu2 %v1325_v21  ;;  %v110_v21 = vunpack.c.0.s8 %v1509_v54 }
  0x3b   :  { %698 = vmatpush.bf16.msrb.mxu3 %v1332_v22  ;;  %v64_v22 = vcvt.s32.f32 %v40_v58  ;;  %v89_v42 = vpack.c.bf16 %v71_v33, %v65_v30 }
  0x3c   :  { %634 = vmatpush.bf16.msrb.mxu0 %v1517_v18  ;;  %v134_v35 = vcvt.s32.f32 %v110_v21 }
  0x3d   :  { %653 = vmatpush.bf16.msrb.mxu1 %v1529_v23  ;;  %v88_v41 = vpack.c.bf16 %v70_v29, %v64_v22 }
  0x3e   :  { %680 = vmatpush.bf16.msrb.mxu2 %v1357_v31  ;;  %v1545_v31 = vld [vmem:[%s1702_s3 + $0x140] sm:$0xff] }
  0x3f   :  { %699 = vmatpush.bf16.msrb.mxu3 %v1362_v32  ;;  %v152_v32 = vpack.c.bf16 %v134_v35, %v128_v34  ;;  %814 = vperm.xlu0 %1156, %v807_v39  }
  0x40   :  { %635 = vmatpush.bf16.msrb.mxu0 %v1538_v27 }
  0x41   :  { %654 = vmatpush.bf16.msrb.mxu1 %v1545_v31 }
  0x42   :  { %681 = vmatpush.bf16.msrb.mxu2 %v1381_v43  ;;  %v798_v43 = vld [vmem:[%s1701_s2 + $0x10] sm:$0xff] }
  0x43   :  { %700 = vmatpush.bf16.msrb.mxu3 %v1386_v44  ;;  %636 = vmatmul.bf16.vlgmr.msrb.gmra.mxu0 %v88_v41  ;;  %v35_v44 = vld [vmem:[%s1699_s0 + $0x2c] sm:$0xf]  ;;  %vm802_vm2 = vcmp.ne.s32.totalorder %v798_v43, 0 }
  0x44   :  { %712 = vmatpush.bf16.msra.mxu0 %v1219_v3  ;;  %655 = vmatmul.bf16.vlgmr.msrb.gmra.mxu1 %v89_v42  ;;  %v33_v3 = vld [vmem:[%s1699_s0 + $0x20] sm:$0xf]  ;;  %v58_v46 = vunpack.c.0.s8 %v35_v44  ;;  %v59_v48 = vunpack.c.1.s8 %v35_v44 }
  0x45   :  { %731 = vmatpush.bf16.msra.mxu1 %v1224_v4  ;;  %682 = vmatmul.bf16.vlgmr.msrb.gmra.mxu2 %v152_v32  ;;  %v1570_v4 = vld [vmem:[%s1700_s1 + $0x18] sm:$0xff]  ;;  %v53_v14 = vunpack.c.1.s8 %v33_v3 }
  0x46   :  { %750 = vmatpush.bf16.msra.mxu2 %v1403_v51  ;;  %701 = vmatmul.bf16.vlgmr.msrb.gmra.mxu3 %v153_v10  ;;  %v1575_v51 = vld [vmem:[%s1700_s1 + $0x24] sm:$0xff]  ;;  %v116_v17 = vunpack.c.0.s8 %v1570_v4  ;;  %v82_v58 = vcvt.s32.f32 %v58_v46  ;;  %v83_v62 = vcvt.s32.f32 %v59_v48  ;;  %v119_v34 = vunpack.c.3.s8 %v1570_v4 }
  0x47   :  { %769 = vmatpush.bf16.msra.mxu3 %v1412_v56  ;;  %v808_v56 = vsel %vm802_vm2, 1, %v1162_v45  ;;  %v122_v55 = vunpack.c.0.s8 %v1575_v51  ;;  %v77_v59 = vcvt.s32.f32 %v53_v14  ;;  %v124_v33 = vunpack.c.2.s8 %v1575_v51 }
  0x48   :  { %713 = vmatpush.bf16.msra.mxu0 %v1243_v7  ;;  %v799_v7 = vld [vmem:[%s1701_s2 + $0x18] sm:$0xff]  ;;  %817 = vperm.xlu1 %1157, %v808_v56   ;;  %v140_v63 = vcvt.s32.f32 %v116_v17  ;;  %v125_v35 = vunpack.c.3.s8 %v1575_v51  ;;  %v143_v32 = vcvt.s32.f32 %v119_v34 }
  0x49   :  { %732 = vmatpush.bf16.msra.mxu1 %v1248_v8  ;;  %v117_v8 = vunpack.c.1.s8 %v1570_v4  ;;  %vm803_vm3 = vcmp.ne.s32.totalorder %v799_v7, 0  ;;  %v146_v0 = vcvt.s32.f32 %v122_v55  ;;  %v148_v42 = vcvt.s32.f32 %v124_v33 }
  0x4a   :  { %751 = vmatpush.bf16.msra.mxu2 %v1419_v57  ;;  %v52_v57 = vunpack.c.0.s8 %v33_v3  ;;  %v809_v1 = vsel %vm803_vm3, 1, %v1162_v45  ;;  %v149_v10 = vcvt.s32.f32 %v125_v35 }
  0x4b   :  { %770 = vmatpush.bf16.msra.mxu3 %v1432_v60  ;;  %v123_v60 = vunpack.c.1.s8 %v1575_v51 }
  0x4c   :  { %714 = vmatpush.bf16.msra.mxu0 %v1267_v11  ;;  %v141_v11 = vcvt.s32.f32 %v117_v8 }
  0x4d   :  { %733 = vmatpush.bf16.msra.mxu1 %v1272_v12  ;;  %v147_v21 = vcvt.s32.f32 %v123_v60 }
  0x4e   :  { %752 = vmatpush.bf16.msra.mxu2 %v1439_v61  ;;  %v76_v61 = vcvt.s32.f32 %v52_v57  ;;  %v161_v57 = vpack.c.bf16 %v149_v10, %v143_v32 }
  0x4f   :  { %771 = vmatpush.bf16.msra.mxu3 %v1446_v5  ;;  %v95_v5 = vpack.c.bf16 %v83_v62, %v77_v59  ;;  %v159_v2 = vpack.c.bf16 %v147_v21, %v141_v11 }
  0x50   :  { %715 = vmatpush.bf16.msra.mxu0 %v1291_v15  ;;  %v94_v12 = vpack.c.bf16 %v82_v58, %v76_v61  ;;  %820 = vperm.xlu1 %1157, %v809_v1   ;;  %v97_v15 = vld [vmem:[%s1700_s1 + $0x8] sm:$0xf] }
  0x51   :  { %734 = vmatpush.bf16.msra.mxu1 %v1296_v16  ;;  %v99_v16 = vld [vmem:[%s1700_s1 + $0x14] sm:$0xf] }
  0x52   :  { %753 = vmatpush.bf16.msra.mxu2 %v1453_v28  ;;  %v158_v28 = vpack.c.bf16 %v146_v0, %v140_v63  ;;  %v114_v45 = vunpack.c.0.s8 %v99_v16 }
  0x53   :  { %772 = vmatpush.bf16.msra.mxu3 %v1460_v9  ;;  %641 = vmatmul.bf16.gmra.mxu0 %v94_v12  ;;  %v113_v9 = vunpack.c.3.s8 %v1509_v54 }
  0x54   :  { %716 = vmatpush.bf16.msra.mxu0 %v1313_v19  ;;  %660 = vmatmul.bf16.gmra.mxu1 %v95_v5  ;;  %v106_v19 = vunpack.c.2.s8 %v1504_v53 }
  0x55   :  { %735 = vmatpush.bf16.msra.mxu1 %v1318_v20  ;;  %687 = vmatmul.bf16.gmra.mxu2 %v158_v28  ;;  %v112_v20 = vunpack.c.2.s8 %v1509_v54  ;;  %v137_v24 = vcvt.s32.f32 %v113_v9 }
  0x56   :  { %754 = vmatpush.bf16.msra.mxu2 %v1467_v40  ;;  %706 = vmatmul.bf16.gmra.mxu3 %v159_v2  ;;  %v108_v40 = vunpack.c.0.s8 %v97_v15 }
  0x57   :  { %773 = vmatpush.bf16.msra.mxu3 %v1476_v13  ;;  %v109_v13 = vunpack.c.1.s8 %v97_v15 }
  0x58   :  { %717 = vmatpush.bf16.msra.mxu0 %v1345_v25  ;;  %v107_v25 = vunpack.c.3.s8 %v1504_v53  ;;  %v132_v22 = vcvt.s32.f32 %v108_v40  ;;  %v138_v53 = vcvt.s32.f32 %v114_v45 }
  0x59   :  { %736 = vmatpush.bf16.msra.mxu1 %v1350_v26  ;;  %v130_v26 = vcvt.s32.f32 %v106_v19  ;;  %v133_v54 = vcvt.s32.f32 %v109_v13  ;;  %v1641_v19 = vld [vmem:[%s1703_s4] ss:$0 sm:$0xff] }
  0x5a   :  { %755 = vmatpush.bf16.msra.mxu2 %v1483_v47  ;;  %v115_v47 = vunpack.c.1.s8 %v99_v16  ;;  %v156_v30 = vpack.c.bf16 %v138_v53, %v132_v22 }
  0x5b   :  { %774 = vmatpush.bf16.msra.mxu3 %v1499_v52  ;;  %v136_v52 = vcvt.s32.f32 %v112_v20 }
  0x5c   :  { %718 = vmatpush.bf16.msra.mxu0 %v1369_v37  ;;  %v139_v29 = vcvt.s32.f32 %v115_v47 }
  0x5d   :  { %737 = vmatpush.bf16.msra.mxu1 %v1374_v38  ;;  %v154_v37 = vpack.c.bf16 %v136_v52, %v130_v26 }
  0x5e   :  { %756 = vmatpush.bf16.msra.mxu2 %v1517_v18  ;;  %v131_v18 = vcvt.s32.f32 %v107_v25 }
  0x5f   :  { %775 = vmatpush.bf16.msra.mxu3 %v1529_v23  ;;  %v157_v23 = vpack.c.bf16 %v139_v29, %v133_v54 }
  0x60   :  { %719 = vmatpush.bf16.msra.mxu0 %v1393_v49  ;;  %v155_v38 = vpack.c.bf16 %v137_v24, %v131_v18  ;;  %v103_v49 = vld [vmem:[%s1700_s1 + $0x2c] sm:$0xf] }
  0x61   :  { %738 = vmatpush.bf16.msra.mxu1 %v1398_v50  ;;  %v118_v50 = vunpack.c.2.s8 %v1570_v4  ;;  %v126_v6 = vunpack.c.0.s8 %v103_v49  ;;  %v127_v39 = vunpack.c.1.s8 %v103_v49 }
  0x62   :  { %757 = vmatpush.bf16.msra.mxu2 %v1538_v27  ;;  %v101_v27 = vld [vmem:[%s1700_s1 + $0x20] sm:$0xf] }
  0x63   :  { %776 = vmatpush.bf16.msra.mxu3 %v1545_v31  ;;  %720 = vmatmul.bf16.vlgmr.msra.gmra.mxu0 %v154_v37  ;;  %v120_v31 = vunpack.c.0.s8 %v101_v27  ;;  %v121_v36 = vunpack.c.1.s8 %v101_v27  ;;  %v142_v41 = vcvt.s32.f32 %v118_v50  ;;  %v150_v3 = vcvt.s32.f32 %v126_v6 }
  0x64   :  { %739 = vmatmul.bf16.vlgmr.msra.gmra.mxu1 %v155_v38  ;;  %v151_v56 = vcvt.s32.f32 %v127_v39 }
  0x65   :  { %758 = vmatmul.bf16.vlgmr.msra.gmra.mxu2 %v156_v30  ;;  %v144_v43 = vcvt.s32.f32 %v120_v31  ;;  %v145_v44 = vcvt.s32.f32 %v121_v36  ;;  %v160_v7 = vpack.c.bf16 %v148_v42, %v142_v41 }
  0x66   :  { %777 = vmatmul.bf16.vlgmr.msra.gmra.mxu3 %v157_v23 }
  0x67   :  { %v162_v46 = vpack.c.bf16 %v150_v3, %v144_v43  ;;  %v163_v14 = vpack.c.bf16 %v151_v56, %v145_v44 }
  0x73   :  { %725 = vmatmul.bf16.gmra.mxu0 %v160_v7 }
  0x74   :  { %744 = vmatmul.bf16.gmra.mxu1 %v161_v57  ;;  %v1659_v57 = vld [vmem:[%s1704_s5 + $0x1] ss:$0 sm:$0xff] }
  0x75   :  { %763 = vmatmul.bf16.gmra.mxu2 %v162_v46  ;;  %v1664_v46 = vld [vmem:[%s1704_s5] ss:$0 sm:$0xff] }
  0x76   :  { %782 = vmatmul.bf16.gmra.mxu3 %v163_v14 }
  0xa0   :  { %v561_v4 = vpop.f32.mrf.mxu0 }
  0xa1   :  { %v580_v51 = vpop.f32.mrf.mxu1  ;;  %v562_v45 = vadd.f32 %v1641_v19, %v561_v4 }
  0xa3   :  { %v581_v13 = vadd.f32 %v580_v51, %v562_v45 }
  0xa8   :  { %v599_v48 = vpop.f32.mrf.mxu2  ;;  %v563_v55 = vpop.f32.mrf.mxu0 }
  0xa9   :  { %v618_v17 = vpop.f32.mrf.mxu3  ;;  %v582_v8 = vpop.f32.mrf.mxu1  ;;  %v600_v24 = vadd.f32 %v599_v48, %v581_v13  ;;  %v564_v22 = vadd.f32 %v1641_v19, %v563_v55 }
  0xaa   :  { %v812_v31 = vpop.permute.xlu0 %811 }
  0xab   :  { %v619_v54 = vadd.f32 %v618_v17, %v600_v24  ;;  %v583_v29 = vadd.f32 %v582_v8, %v564_v22  ;;  %vm822_vm4 = vcmp.eq.s32.totalorder %v812_v31, 1 }
  0xb0   :  { %v601_v60 = vpop.f32.mrf.mxu2  ;;  %v566_v58 = vpop.f32.mrf.mxu0 }
  0xb1   :  { %v620_v61 = vpop.f32.mrf.mxu3  ;;  %v585_v59 = vpop.f32.mrf.mxu1  ;;  %v602_v49 = vadd.f32 %v601_v60, %v583_v29  ;;  %v567_v50 = vadd.f32 %v1641_v19, %v566_v58  ;;  %v828_v58 = vsel %vm822_vm4, %v1659_v57, %v1664_v46 }
  0xb3   :  { %v621_v36 = vadd.f32 %v620_v61, %v602_v49  ;;  %v586_v39 = vadd.f32 %v585_v59, %v567_v50  ;;  %v832_v59 = vsel %vm822_vm4, %v1664_v46, %v1659_v57 }
  0xb8   :  { %v604_v62 = vpop.f32.mrf.mxu2  ;;  %v568_v0 = vpop.f32.mrf.mxu0 }
  0xb9   :  { %v623_v63 = vpop.f32.mrf.mxu3  ;;  %v1632_v1 = vpop.f32.mrf.mxu1  ;;  %v605_v7 = vadd.f32 %v604_v62, %v586_v39  ;;  %v569_v48 = vadd.f32 %v1641_v19, %v568_v0 }
  0xba   :  { %v815_v62 = vpop.permute.xlu0 %814  ;;  %v818_v49 = vpop.permute.xlu1 %817 }
  0xbb   :  { %v624_v61 = vadd.f32 %v623_v63, %v605_v7  ;;  %vm823_vm5 = vcmp.eq.s32.totalorder %v815_v62, 1  ;;  %vm824_vm7 = vcmp.eq.s32.totalorder %v818_v49, 1 }
  0xc0   :  { %v1634_v11 = vpop.f32.mrf.mxu2  ;;  %v637_v12 = vpop.f32.mrf.mxu0 }
  0xc1   :  { %v1636_v21 = vpop.f32.mrf.mxu3  ;;  %v656_v5 = vpop.f32.mrf.mxu1  ;;  %v638_v38 = vadd.f32 %v637_v12, %v619_v54 }
  0xc3   :  { %v657_v35 = vadd.f32 %v656_v5, %v638_v38 }
  0xc5   :  { %v666_v10 = vmax.f32 %v657_v35, 0.0 }
  0xc7   :  { %v670_v55 = vmin.f32 %v666_v10, 255.0 }
  0xc8   :  { %v683_v28 = vpop.f32.mrf.mxu2  ;;  %v639_v15 = vpop.f32.mrf.mxu0 }
  0xc9   :  { %v702_v2 = vpop.f32.mrf.mxu3  ;;  %v658_v16 = vpop.f32.mrf.mxu1  ;;  %v684_v53 = vadd.f32 %v1641_v19, %v683_v28  ;;  %v640_v42 = vadd.f32 %v639_v15, %v621_v36  ;;  %v588_v28 = vadd.f32 %v1632_v1, %v569_v48  ;;  %v836_v63 = vmul.f32 %v828_v58, %v670_v55 }
  0xcb   :  { %v703_v30 = vadd.f32 %v702_v2, %v684_v53  ;;  %v659_v17 = vadd.f32 %v658_v16, %v640_v42 }
  0xcd   :  { %v667_v2 = vmax.f32 %v659_v17, 0.0 }
  0xcf   :  { %v671_v54 = vmin.f32 %v667_v2, 255.0 }
  0xd0   :  { %v685_v20 = vpop.f32.mrf.mxu2  ;;  %v642_v9 = vpop.f32.mrf.mxu0 }
  0xd1   :  { %v704_v25 = vpop.f32.mrf.mxu3  ;;  %v1643_v40 = vpop.f32.mrf.mxu1  ;;  %v686_v6 = vadd.f32 %v1641_v19, %v685_v20  ;;  %v643_v15 = vadd.f32 %v642_v9, %v624_v61  ;;  %v829_v9 = vsel %vm823_vm5, %v1659_v57, %v1664_v46 }
  0xd3   :  { %v705_v43 = vadd.f32 %v704_v25, %v686_v6  ;;  %v662_v29 = vadd.f32 %v1643_v40, %v643_v15 }
  0xd5   :  { %v668_v40 = vmax.f32 %v662_v29, 0.0 }
  0xd7   :  { %v672_v10 = vmin.f32 %v668_v40, 255.0 }
  0xd8   :  { %v688_v47 = vpop.f32.mrf.mxu2  ;;  %v1646_v52 = vpop.f32.mrf.mxu0 }
  0xd9   :  { %v707_v26 = vpop.f32.mrf.mxu3  ;;  %v1648_v18 = vpop.f32.mrf.mxu1  ;;  %v689_v8 = vadd.f32 %v1641_v19, %v688_v47  ;;  %v607_v47 = vadd.f32 %v1634_v11, %v588_v28 }
  0xdb   :  { %v708_v16 = vadd.f32 %v707_v26, %v689_v8  ;;  %v626_v11 = vadd.f32 %v1636_v21, %v607_v47 }
  0xdd   :  { %v645_v31 = vadd.f32 %v1646_v52, %v626_v11  ;;  %v834_v52 = vsel %vm824_vm7, %v1664_v46, %v1659_v57 }
  0xdf   :  { %v664_v21 = vadd.f32 %v1648_v18, %v645_v31 }
  0xe0   :  { %v690_v37 = vpop.f32.mrf.mxu2  ;;  %v721_v27 = vpop.f32.mrf.mxu0 }
  0xe1   :  { %v1652_v23 = vpop.f32.mrf.mxu3  ;;  %v740_v33 = vpop.f32.mrf.mxu1  ;;  %v722_v34 = vadd.f32 %v721_v27, %v703_v30  ;;  %v691_v26 = vadd.f32 %v1641_v19, %v690_v37  ;;  %v833_v27 = vsel %vm823_vm5, %v1664_v46, %v1659_v57  ;;  %v669_v48 = vmax.f32 %v664_v21, 0.0 }
  0xe3   :  { %v741_v41 = vadd.f32 %v740_v33, %v722_v34  ;;  %v837_v34 = vmul.f32 %v829_v9, %v671_v54  ;;  %v710_v6 = vadd.f32 %v1652_v23, %v691_v26  ;;  %v673_v61 = vmin.f32 %v669_v48, 255.0 }
  0xe8   :  { %v759_v32 = vpop.f32.mrf.mxu2  ;;  %v723_v56 = vpop.f32.mrf.mxu0 }
  0xe9   :  { %v760_v3 = vadd.f32 %v759_v32, %v741_v41  ;;  %v778_v44 = vpop.f32.mrf.mxu3  ;;  %v742_v14 = vpop.f32.mrf.mxu1  ;;  %v724_v51 = vadd.f32 %v723_v56, %v705_v43 }
  0xeb   :  { %v779_v4 = vadd.f32 %v778_v44, %v760_v3  ;;  %v743_v5 = vadd.f32 %v742_v14, %v724_v51  ;;  %v830_v44 = vsel %vm824_vm7, %v1659_v57, %v1664_v46  ;;  %v821_v14 = vpop.permute.xlu1 %820 }
  0xec   :  { %v838_v51 = vmul.f32 %v830_v44, %v672_v10  ;;  %vm825_vm8 = vcmp.eq.s32.totalorder %v821_v14, 1 }
  0xed   :  { %v788_v60 = vmax.f32 %v779_v4, 0.0  ;;  %v831_v62 = vsel %vm825_vm8, %v1659_v57, %v1664_v46 }
  0xee   :  { %v839_v28 = vmul.f32 %v831_v62, %v673_v61 }
  0xef   :  { %v792_v12 = vmin.f32 %v788_v60, 255.0 }
  0xf0   :  { %v761_v0 = vpop.f32.mrf.mxu2  ;;  %v726_v13 = vpop.f32.mrf.mxu0 }
  0xf1   :  { %v840_v20 = vmul.f32 %v832_v59, %v792_v12  ;;  %v762_v25 = vadd.f32 %v761_v0, %v743_v5  ;;  %v780_v45 = vpop.f32.mrf.mxu3  ;;  %v727_v22 = vadd.f32 %v726_v13, %v708_v16  ;;  %v745_v1 = vpop.f32.mrf.mxu1  ;;  %v835_v5 = vsel %vm825_vm8, %v1664_v46, %v1659_v57  ;;  %v1161_v16 = vld [vmem:[#allocation2] ss:$0 sm:$0xff] }
  0xf3   :  { %v781_v24 = vadd.f32 %v780_v45, %v762_v25  ;;  %v844_v53 = vadd.f32 %v840_v20, %v836_v63  ;;  %v746_v33 = vadd.f32 %v745_v1, %v727_v22 }
  0xf5   :  { %v789_v38 = vmax.f32 %v781_v24, 0.0  ;;  %v849_v30 = vsel %vm848_vm6, %v844_v53, 0.0 }
  0xf6   :  { %850 = vadd.xlane.f32.xlu2 %v849_v30 }
  0xf7   :  { %v793_v50 = vmin.f32 %v789_v38, 255.0 }
  0xf8   :  { %v764_v35 = vpop.f32.mrf.mxu2  ;;  %v728_v39 = vpop.f32.mrf.mxu0 }
  0xf9   :  { %v841_v19 = vmul.f32 %v833_v27, %v793_v50  ;;  %v765_v37 = vadd.f32 %v764_v35, %v746_v33  ;;  %v783_v36 = vpop.f32.mrf.mxu3  ;;  %v729_v42 = vadd.f32 %v728_v39, %v710_v6  ;;  %v747_v23 = vpop.f32.mrf.mxu1 }
  0xfb   :  { %v784_v41 = vadd.f32 %v783_v36, %v765_v37  ;;  %v845_v32 = vadd.f32 %v841_v19, %v837_v34  ;;  %v748_v7 = vadd.f32 %v747_v23, %v729_v42 }
  0xfd   :  { %v790_v43 = vmax.f32 %v784_v41, 0.0  ;;  %v852_v3 = vsel %vm848_vm6, %v845_v32, 0.0 }
  0xfe   :  { %853 = vadd.xlane.f32.xlu2 %v852_v3 }
  0xff   :  { %v794_v56 = vmin.f32 %v790_v43, 255.0 }
 0x100   :  { %v766_v4 = vpop.f32.mrf.mxu2 }
 0x101   :  { %v842_v17 = vmul.f32 %v834_v52, %v794_v56  ;;  %v767_v55 = vadd.f32 %v766_v4, %v748_v7  ;;  %v785_v18 = vpop.f32.mrf.mxu3 }
 0x103   :  { %v786_v8 = vadd.f32 %v785_v18, %v767_v55  ;;  %v846_v60 = vadd.f32 %v842_v17, %v838_v51 }
 0x105   :  { %v791_v58 = vmax.f32 %v786_v8, 0.0  ;;  %v855_v59 = vsel %vm848_vm6, %v846_v60, 0.0 }
 0x106   :  { %856 = vadd.xlane.f32.xlu0 %v855_v59 }
 0x107   :  { %v795_v12 = vmin.f32 %v791_v58, 255.0 }
 0x109   :  { %v843_v2 = vmul.f32 %v835_v5, %v795_v12 }
 0x10b   :  { %v847_v15 = vadd.f32 %v843_v2, %v839_v28 }
 0x10d   :  { %v858_v0 = vsel %vm848_vm6, %v847_v15, 0.0 }
 0x10e   :  { %859 = vadd.xlane.f32.xlu1 %v858_v0 }
 0x169   :  { %v851_v20 = vpop.xlane.xlu2 %850 }
 0x16a   :  { %v865_v25 = vadd.f32 %v1161_v16, %v851_v20 }
 0x16c   :  { %870 = vst.msk [vmem:[#allocation3] sm:$0xff] %vm869_vm9, %v865_v25 }
 0x171   :  { %v854_v45 = vpop.xlane.xlu2 %853 }
 0x173   :  { %v904_v13 = vld [vmem:[#allocation3] sm:$0xff] }
 0x174   :  { %905 = vst [vmem:[%s1706_s7] sm:$0xff] %v904_v13 }
 0x179   :  { %v857_v63 = vpop.xlane.xlu0 %856 }
 0x181   :  { %v860_v47 = vpop.xlane.xlu1 %859 }

</bundles_post_ra>
